<compile_context>
chip_gen: v6e
topology: v6e:2x2x1
jax: 0.10.0
libtpu: 0.0.40
codegen_flags: <defaults>
</compile_context>

<pallas_src>
import functools

import jax
import jax.numpy as jnp
from jax.experimental import pallas as pl
from jax.experimental.pallas import tpu as pltpu

HIDDEN = 24
BIAS_ROWS = 8


def _round_up(x, m):
    return ((x + m - 1) // m) * m


def mlp_kernel(x_ref, p_ref, o_ref, *, in_units, in_rows, h, out_units):
    cdt = p_ref.dtype                                      # MXU operand dtype (f32 or bf16)

    w1 = p_ref[0:in_units, :]                              # (in_units, h)
    w2 = p_ref[in_rows:in_rows + h, :]                     # (h, h)
    w3 = p_ref[in_rows + h:in_rows + 2 * h, :]             # (h, h); cols >= out_units are 0
    b_blk = p_ref[in_rows + 2 * h:in_rows + 2 * h + BIAS_ROWS, :].astype(jnp.float32)
    b1 = b_blk[0:1, :]
    b2 = b_blk[1:2, :]
    b3 = b_blk[2:3, :]

    x = x_ref[...].astype(cdt)                             # (tb, in_units), no lane padding
    h1 = jnp.maximum(jnp.dot(x, w1, preferred_element_type=jnp.float32) + b1, 0.0)
    h2 = jnp.maximum(jnp.dot(h1.astype(cdt), w2, preferred_element_type=jnp.float32) + b2, 0.0)
    y = jnp.dot(h2.astype(cdt), w3, preferred_element_type=jnp.float32) + b3
    o_ref[...] = y[:, :out_units].astype(o_ref.dtype)      # narrow (tb, out_units) store


def pack_params(params, dtype=jnp.float32, hidden=HIDDEN):
    """Pack W1/W2/W3/b1/b2/b3 into one small slab of shape
    (round_up(in,8) + 2*round_up(hidden,8) + 8, round_up(hidden,8))."""
    w1, w2, w3 = params["w1"], params["w2"], params["w3"]
    b1, b2, b3 = params["b1"], params["b2"], params["b3"]
    in_units = w1.shape[0]
    h = _round_up(hidden, 8)
    in_rows = _round_up(in_units, 8)

    def pad2d(a, rows, cols):
        out = jnp.zeros((rows, cols), jnp.float32)
        return out.at[: a.shape[0], : a.shape[1]].set(a)

    def pad_row(b, cols):
        b = b.reshape(1, -1)
        out = jnp.zeros((1, cols), jnp.float32)
        return out.at[:, : b.shape[1]].set(b)

    bias_blk = jnp.concatenate(
        [pad_row(b1, h), pad_row(b2, h), pad_row(b3, h),
         jnp.zeros((BIAS_ROWS - 3, h), jnp.float32)], axis=0)

    slab = jnp.concatenate(
        [pad2d(w1, in_rows, h), pad2d(w2, h, h), pad2d(w3, h, h), bias_blk], axis=0)
    return slab.astype(dtype)


def deep_model_forward(x, slab, output_units, *, hidden=HIDDEN, tb_max=4096):
    """x: (B, input_units) f32.  slab: packed params (f32 or bf16)."""
    B, in_units = x.shape
    h = _round_up(hidden, 8)
    in_rows = _round_up(in_units, 8)
    assert slab.shape == (in_rows + 2 * h + BIAS_ROWS, h), slab.shape

    # Batch tiling: cap the tile at tb_max rows, waste at most ~8 padded rows
    # per tile, and use >= 2 grid steps when B >= 16 so both v7x cores get work.
    min_tiles = 2 if B >= 16 else 1
    n_tiles = max(pl.cdiv(B, tb_max), min_tiles)
    tb = _round_up(pl.cdiv(B, n_tiles), 8)
    b_pad = n_tiles * tb
    if b_pad != B:
        x = jnp.pad(x, ((0, b_pad - B), (0, 0)))           # batch-dim-only padding

    kernel = functools.partial(
        mlp_kernel, in_units=in_units, in_rows=in_rows, h=h, out_units=output_units)

    out_padded = pl.pallas_call(
        kernel,
        out_shape=jax.ShapeDtypeStruct((b_pad, output_units), jnp.float32),
        grid_spec=pltpu.PrefetchScalarGridSpec(
            num_scalar_prefetch=0,
            grid=(n_tiles,),
            in_specs=[
                pl.BlockSpec((tb, in_units), lambda i: (i, 0)),   # narrow x tile
                pl.BlockSpec(slab.shape, lambda i: (0, 0)),       # resident param slab
            ],
            out_specs=pl.BlockSpec((tb, output_units), lambda i: (i, 0)),
        ),
        compiler_params=pltpu.CompilerParams(
            dimension_semantics=("parallel",),
        ),
    )(x, slab)

    return out_padded[:B]


def init_params(key, input_units, output_units, hidden=HIDDEN):
    """Kaiming-normal weights, nn.Linear-style uniform biases (nonzero, so the
    bias path is actually exercised)."""
    ks = jax.random.split(key, 6)

    def kaiming(k, fan_in, fan_out):
        return jax.random.normal(k, (fan_in, fan_out), jnp.float32) * jnp.sqrt(2.0 / fan_in)

    def bias(k, fan_in, n):
        bound = 1.0 / jnp.sqrt(float(fan_in))
        return jax.random.uniform(k, (1, n), jnp.float32, -bound, bound)

    return {
        "w1": kaiming(ks[0], input_units, hidden), "b1": bias(ks[1], input_units, hidden),
        "w2": kaiming(ks[2], hidden, hidden),      "b2": bias(ks[3], hidden, hidden),
        "w3": kaiming(ks[4], hidden, output_units),"b3": bias(ks[5], hidden, output_units),
    }


def reference_forward(x, p):
    h1 = jnp.maximum(x @ p["w1"] + p["b1"], 0.0)
    h2 = jnp.maximum(h1 @ p["w2"] + p["b2"], 0.0)
    return h2 @ p["w3"] + p["b3"]


def reference_forward_mixed(x, p, cdt):
    """Mirrors the kernel's mixed-precision math (cdt operands, f32 accumulation)."""
    def mm(a, w):
        return jnp.dot(a.astype(cdt), w.astype(cdt), preferred_element_type=jnp.float32)
    def b(v):
        return v.astype(cdt).astype(jnp.float32)
    h1 = jnp.maximum(mm(x, p["w1"]) + b(p["b1"]), 0.0)
    h2 = jnp.maximum(mm(h1, p["w2"]) + b(p["b2"]), 0.0)
    return mm(h2, p["w3"]) + b(p["b3"])


if __name__ == "__main__":
    key = jax.random.PRNGKey(0)
    kx, kx2, kp = jax.random.split(key, 3)

    input_units = 4      # e.g. CartPole observation dim
    output_units = 2     # e.g. action logits

    params = init_params(kp, input_units, output_units)
    slab_f32 = pack_params(params, dtype=jnp.float32)

    # --- small batch (single tile, grid of 1) ---
    batch = 8
    x = jax.random.normal(kx, (batch, input_units), jnp.float32)
    out = jax.block_until_ready(deep_model_forward(x, slab_f32, output_units))
    ref = reference_forward(x, params)
    assert out.shape == (batch, output_units)
    assert jnp.allclose(out, ref, atol=1e-4, rtol=1e-4), "small-batch f32 mismatch"

    # --- larger, non-multiple batch: exercises batch padding + 2-step grid ---
    batch2 = 1000
    x2 = jax.random.normal(kx2, (batch2, input_units), jnp.float32)
    out2 = jax.block_until_ready(deep_model_forward(x2, slab_f32, output_units))
    ref2 = reference_forward(x2, params)
    assert out2.shape == (batch2, output_units)
    assert jnp.allclose(out2, ref2, atol=1e-4, rtol=1e-4), "large-batch f32 mismatch"

    # --- bf16-operand MXU path (v6e/v7x recommendation), f32 accumulation ---
    slab_bf16 = pack_params(params, dtype=jnp.bfloat16)
    out_bf = jax.block_until_ready(deep_model_forward(x2, slab_bf16, output_units))
    ref_bf = reference_forward_mixed(x2, params, jnp.bfloat16)
    assert out_bf.shape == (batch2, output_units)
    assert jnp.allclose(out_bf, ref_bf, atol=1e-3, rtol=1e-3), "bf16-path mismatch"
    # coarse sanity bound vs the full-f32 reference (bf16 rounding only, typ ~1e-2)
    assert float(jnp.max(jnp.abs(out_bf - ref2))) < 0.25

    print("KERNEL_OK")
</pallas_src>

<mosaic_0001>
module attributes {stable_mosaic.version = 11 : i64} {
  func.func @mlp_kernel(%arg0: i32, %arg1: memref<8x4xf32, #tpu.memory_space<vmem>>, %arg2: memref<64x24xf32, #tpu.memory_space<vmem>>, %arg3: memref<8x2xf32, #tpu.memory_space<vmem>>) attributes {dimension_semantics = [#tpu.dimension_semantics<parallel>], iteration_bounds = array<i64: 1>, scalar_prefetch = 0 : i64, scratch_operands = 0 : i64, tpu.core_type = #tpu.core_type<tc>, window_params = [{transform_indices = @transform_0, window_bounds = array<i64: 8, 4>}, {pipeline_mode = #tpu.pipeline_mode<synchronous>, transform_indices = @transform_1, window_bounds = array<i64: 64, 24>}, {transform_indices = @transform_2, window_bounds = array<i64: 8, 2>}]} {
    %c0 = arith.constant 0 : index
    %c0_0 = arith.constant 0 : index
    %0 = vector.load %arg2[%c0, %c0_0] : memref<64x24xf32, #tpu.memory_space<vmem>>, vector<4x24xf32>
    %c8 = arith.constant 8 : index
    %c0_1 = arith.constant 0 : index
    %1 = vector.load %arg2[%c8, %c0_1] : memref<64x24xf32, #tpu.memory_space<vmem>>, vector<24x24xf32>
    %c32 = arith.constant 32 : index
    %c0_2 = arith.constant 0 : index
    %2 = vector.load %arg2[%c32, %c0_2] : memref<64x24xf32, #tpu.memory_space<vmem>>, vector<24x24xf32>
    %c56 = arith.constant 56 : index
    %c0_3 = arith.constant 0 : index
    %3 = vector.load %arg2[%c56, %c0_3] : memref<64x24xf32, #tpu.memory_space<vmem>>, vector<8x24xf32>
    %4 = vector.extract_strided_slice %3 {offsets = [0, 0], sizes = [1, 24], strides = [1, 1]} : vector<8x24xf32> to vector<1x24xf32>
    %5 = vector.extract_strided_slice %3 {offsets = [1, 0], sizes = [1, 24], strides = [1, 1]} : vector<8x24xf32> to vector<1x24xf32>
    %6 = vector.extract_strided_slice %3 {offsets = [2, 0], sizes = [1, 24], strides = [1, 1]} : vector<8x24xf32> to vector<1x24xf32>
    %c0_4 = arith.constant 0 : index
    %c0_5 = arith.constant 0 : index
    %7 = vector.load %arg1[%c0_4, %c0_5] : memref<8x4xf32, #tpu.memory_space<vmem>>, vector<8x4xf32>
    %cst = arith.constant dense<0.000000e+00> : vector<8x24xf32>
    %8 = tpu.matmul %7, %0, %cst {dimension_numbers = #tpu.dot_dimension_numbers<[1], [0], [0], [1], [0, 0, 1, 1], [], []>} : vector<8x4xf32>, vector<4x24xf32>, vector<8x24xf32> -> vector<8x24xf32>
    %9 = vector.broadcast %4 : vector<1x24xf32> to vector<8x24xf32>
    %10 = arith.addf %8, %9 : vector<8x24xf32>
    %cst_6 = arith.constant 0.000000e+00 : f32
    %11 = vector.broadcast %cst_6 : f32 to vector<8x24xf32>
    %12 = arith.maximumf %10, %11 : vector<8x24xf32>
    %cst_7 = arith.constant dense<0.000000e+00> : vector<8x24xf32>
    %13 = tpu.matmul %12, %1, %cst_7 {dimension_numbers = #tpu.dot_dimension_numbers<[1], [0], [0], [1], [0, 0, 1, 1], [], []>} : vector<8x24xf32>, vector<24x24xf32>, vector<8x24xf32> -> vector<8x24xf32>
    %14 = vector.broadcast %5 : vector<1x24xf32> to vector<8x24xf32>
    %15 = arith.addf %13, %14 : vector<8x24xf32>
    %cst_8 = arith.constant 0.000000e+00 : f32
    %16 = vector.broadcast %cst_8 : f32 to vector<8x24xf32>
    %17 = arith.maximumf %15, %16 : vector<8x24xf32>
    %cst_9 = arith.constant dense<0.000000e+00> : vector<8x24xf32>
    %18 = tpu.matmul %17, %2, %cst_9 {dimension_numbers = #tpu.dot_dimension_numbers<[1], [0], [0], [1], [0, 0, 1, 1], [], []>} : vector<8x24xf32>, vector<24x24xf32>, vector<8x24xf32> -> vector<8x24xf32>
    %19 = vector.broadcast %6 : vector<1x24xf32> to vector<8x24xf32>
    %20 = arith.addf %18, %19 : vector<8x24xf32>
    %21 = vector.extract_strided_slice %20 {offsets = [0, 0], sizes = [8, 2], strides = [1, 1]} : vector<8x24xf32> to vector<8x2xf32>
    %c0_10 = arith.constant 0 : index
    %c0_11 = arith.constant 0 : index
    %22 = vector.load %arg3[%c0_10, %c0_11] : memref<8x2xf32, #tpu.memory_space<vmem>>, vector<8x2xf32>
    tpu.vector_store %arg3[%c0_10, %c0_11], %21 {strides = array<i32>} : memref<8x2xf32, #tpu.memory_space<vmem>>, vector<8x2xf32>,
    return
  }
  func.func @transform_0(%arg0: i32) -> (i32, i32) {
    %c0_i32 = arith.constant 0 : i32
    %c0_i32_0 = arith.constant 0 : i32
    return %arg0, %c0_i32 : i32, i32
  }
  func.func @transform_1(%arg0: i32) -> (i32, i32) {
    %c0_i32 = arith.constant 0 : i32
    %c0_i32_0 = arith.constant 0 : i32
    %c0_i32_1 = arith.constant 0 : i32
    return %c0_i32, %c0_i32_0 : i32, i32
  }
  func.func @transform_2(%arg0: i32) -> (i32, i32) {
    %c0_i32 = arith.constant 0 : i32
    %c0_i32_0 = arith.constant 0 : i32
    return %arg0, %c0_i32 : i32, i32
  }
}

</mosaic_0001>

<bundles_post_ra>
// kernel: tpu_custom_call.1
= control target key start
LH: loop header
LB: loop body
LE: loop exit
PB: predicated region body
PF: predicated region fallthrough
CT: control target
= control target key end

     0   :  { %vm28_vm0 = vcmask 1043456   ;;  %vm24_vm1 = vcmask 31744   ;;  %v304_v0 = vmov 0.0   ;;  %vm305_vm2 = vmmov 0   ;;  %s353_s1 = inlined_call_operand.vmem [shape: f32[64,24], index: 1, kind: input, shape index: {}]   ;;  %s354_s0 = inlined_call_operand.vmem [shape: f32[8,4], index: 0, kind: input, shape index: {}]   ;;  %s355_s2 = inlined_call_operand.vmem [shape: f32[8,2], index: 2, kind: output, shape index: {}]  }
   0x1   :  { %279 = vmatprep.subr.mxu0 %v304_v0  ;;  %v11_v1 = vld [vmem:[%s353_s1] sm:$0xf]  ;;  %281 = vmatprep.mubr.msk.f32.mxu0 %vm305_vm2, %v304_v0  ;;  %v14_v3 = vld [vmem:[%s353_s1 + $0x18] sm:$0xff]  ;;  %v13_v4 = vld [vmem:[%s353_s1 + $0x10] sm:$0xff]  ;;  %v20_v6 = vlaneseq  ;;  %vm107_vm3 = vcmask 195584   ;;  %vm259_vm4 = vcmask 15360  }
   0x2   :  { %v19_v2 = vld [vmem:[%s354_s0] sm:$0xff]  ;;  %280 = vmatpush3.msk.msra.mxu0 %vm28_vm0, %v11_v1  ;;  %284 = vmatprep.subr.mxu1 %v304_v0  ;;  %v12_v5 = vld [vmem:[%s353_s1 + $0x8] sm:$0xff]  ;;  %v18_v9 = vld [vmem:[%s353_s1 + $0x38] sm:$0xff] }
   0x3   :  { %282 = vmatmul.mubr.msk.f32.vlgmr.msra.gmra.mxu0 %vm24_vm1, %v19_v2  ;;  %290 = vmatprep.mubr.msk.f32.mxu1 %vm305_vm2, %v304_v0  ;;  %v21_v7 = vshrl.u32 %v20_v6, 7  ;;  %v17_v15 = vld [vmem:[%s353_s1 + $0x30] sm:$0xff]  ;;  %v16_v16 = vld [vmem:[%s353_s1 + $0x28] sm:$0xff]  ;;  %v15_v17 = vld [vmem:[%s353_s1 + $0x20] sm:$0xff] }
   0x4   :  { %293 = vmatprep.subr.mxu0 %v304_v0  ;;  %299 = vmatprep.mubr.msk.f32.mxu0 %vm305_vm2, %v304_v0 }
   0x5   :  { %285 = vmatpush3.msra.mxu1 %v14_v3  ;;  %v22_v8 = vsub.s32 0, %v21_v7  ;;  %294 = vmatpush3.msra.mxu0 %v17_v15  ;;  %v105_v18 = vsub.s32 1, %v21_v7  ;;  %v184_v24 = vsub.s32 2, %v21_v7 }
   0x6   :  { %286 = vmatprep.subr.mxu1 %v304_v0  ;;  %295 = vmatprep.subr.mxu0 %v304_v0 }
   0x7   :  { %287 = vmatpush3.msra.mxu1 %v13_v4  ;;  %v23_v10 = vrot.slane %v18_v9, %v22_v8  ;;  %296 = vmatpush3.msra.mxu0 %v16_v16  ;;  %v106_v19 = vrot.slane %v18_v9, %v105_v18  ;;  %v185_v25 = vrot.slane %v18_v9, %v184_v24 }
   0x8   :  { %288 = vmatprep.subr.mxu1 %v304_v0  ;;  %297 = vmatprep.subr.mxu0 %v304_v0 }
   0x9   :  { %289 = vmatpush3.msra.mxu1 %v12_v5  ;;  %298 = vmatpush3.msra.mxu0 %v15_v17 }
  0xc3   :  { %v98_v11 = vpop.f32.mrf.mxu0 }
  0xc4   :  { %v99_v12 = vadd.f32 %v98_v11, %v23_v10 }
  0xc5   :  { %v283_v13 = vpop.f32.mrf.mxu0 }
  0xc6   :  { %v102_v14 = vmax.f32 %v99_v12, 0.0 }
  0xc8   :  { %291 = vmatmul.mubr.msk.f32.vlgmr.msra.gmra.mxu1 %vm107_vm3, %v102_v14 }
 0x188   :  { %v177_v20 = vpop.f32.mrf.mxu1 }
 0x189   :  { %v178_v21 = vadd.f32 %v177_v20, %v106_v19 }
 0x18a   :  { %v292_v22 = vpop.f32.mrf.mxu1 }
 0x18b   :  { %v181_v23 = vmax.f32 %v178_v21, 0.0 }
 0x18d   :  { %300 = vmatmul.mubr.msk.f32.vlgmr.msra.gmra.mxu0 %vm107_vm3, %v181_v23 }
 0x24d   :  { %v255_v26 = vpop.f32.mrf.mxu0 }
 0x24e   :  { %v256_v27 = vadd.f32 %v255_v26, %v185_v25 }
 0x24f   :  { %v301_v28 = vpop.f32.mrf.mxu0 }
 0x250   :  { %260 = vst.msk [vmem:[%s355_s2] sm:$0xff] %vm259_vm4, %v256_v27 }

</bundles_post_ra>
